<compile_context>
chip_gen: v5e
topology: v5e:2x2
jax: 0.10.0
libtpu: 0.0.40
codegen_flags: <defaults>
</compile_context>

<pallas_src>
import math
import functools

import jax
import jax.numpy as jnp
from jax.experimental import pallas as pl
from jax.experimental.pallas import tpu as pltpu


def _block_kernel(x_ref,
                  wq_ref, bq_ref, wk_ref, bk_ref, wv_ref, bv_ref,
                  wp_ref, bp_ref,
                  g1_ref, be1_ref,
                  w1_ref, b1_ref, w2_ref, b2_ref,
                  g2_ref, be2_ref,
                  o_ref, acc_ref,
                  *, n_heads, head_dim, eps):
    h = pl.program_id(1)                      # head index (innermost, "arbitrary")
    Bb, T, C = x_ref.shape
    R = Bb * T
    scale = 1.0 / math.sqrt(head_dim)

    @pl.when(h == 0)
    def _():
        acc_ref[...] = jnp.zeros_like(acc_ref)

    x = x_ref[...].reshape(R, C)              # (R, C) f32
    xb = x.astype(jnp.bfloat16)

    # --- this head's QKV projections (bf16 MXU, f32 accumulation) ---
    q = jnp.dot(xb, wq_ref[0], preferred_element_type=jnp.float32) + bq_ref[0]
    k = jnp.dot(xb, wk_ref[0], preferred_element_type=jnp.float32) + bk_ref[0]
    v = jnp.dot(xb, wv_ref[0], preferred_element_type=jnp.float32) + bv_ref[0]

    q3 = q.reshape(Bb, T, head_dim).astype(jnp.bfloat16)
    k3 = k.reshape(Bb, T, head_dim).astype(jnp.bfloat16)
    v3 = v.reshape(Bb, T, head_dim).astype(jnp.bfloat16)

    # --- batched causal attention for this head ---
    s = jnp.einsum("btd,bsd->bts", q3, k3,
                   preferred_element_type=jnp.float32) * scale      # (Bb, T, T) f32
    row = jax.lax.broadcasted_iota(jnp.int32, (T, T), 0)
    col = jax.lax.broadcasted_iota(jnp.int32, (T, T), 1)
    s = jnp.where((row >= col)[None], s, -jnp.inf)

    m = jnp.max(s, axis=-1, keepdims=True)
    p = jnp.exp(s - m)
    l = jnp.sum(p, axis=-1, keepdims=True)
    p = p * pl.reciprocal(l, approx=True)                            # EUP slot

    o = jnp.einsum("bts,bsd->btd", p.astype(jnp.bfloat16), v3,
                   preferred_element_type=jnp.float32)               # (Bb, T, D)
    o2 = o.reshape(R, head_dim).astype(jnp.bfloat16)

    # accumulate this head's slice of the output projection
    acc_ref[...] += jnp.dot(o2, wp_ref[0], preferred_element_type=jnp.float32)

    # --- finalize on the last head: residual + LN1 + MLP + residual + LN2 ---
    @pl.when(h == n_heads - 1)
    def _():
        attn = acc_ref[...] + bp_ref[...]                            # (R, C)
        y = x + attn

        mu = jnp.mean(y, axis=-1, keepdims=True)
        var = jnp.mean((y - mu) ** 2, axis=-1, keepdims=True)
        y = (y - mu) * jax.lax.rsqrt(var + eps) * g1_ref[...] + be1_ref[...]

        h1 = jnp.dot(y.astype(jnp.bfloat16), w1_ref[...],
                     preferred_element_type=jnp.float32) + b1_ref[...]
        h1 = jnp.maximum(h1, 0.0)
        h2 = jnp.dot(h1.astype(jnp.bfloat16), w2_ref[...],
                     preferred_element_type=jnp.float32) + b2_ref[...]
        y = y + h2

        mu = jnp.mean(y, axis=-1, keepdims=True)
        var = jnp.mean((y - mu) ** 2, axis=-1, keepdims=True)
        y = (y - mu) * jax.lax.rsqrt(var + eps) * g2_ref[...] + be2_ref[...]

        o_ref[...] = y.reshape(Bb, T, C)


def _pick_batch_block(B):
    # Fuse batch rows per grid step, but keep >= 2 parallel grid steps when
    # possible so both v7x TensorCores can be used (v5e/v6e: single TC, no cost).
    if B <= 1:
        return 1
    target = max(1, B // 2)
    for cand in range(target, 0, -1):
        if B % cand == 0:
            return cand
    return 1


def block_forward(x, params, *, n_heads, eps=1e-5, batch_block=None):
    """x: (B, T, C) float32. params: dict of (in, out)-layout f32 weights."""
    B, T, C = x.shape
    assert C % n_heads == 0
    D = C // n_heads
    M = params["w1"].shape[1]

    if batch_block is None:
        batch_block = _pick_batch_block(B)
    assert B % batch_block == 0
    nb = B // batch_block

    bf16 = jnp.bfloat16
    # Per-head weight layouts with a leading head axis, so BlockSpecs slice the
    # head via the index_map while the trailing two dims stay full (lane rule).
    wqh = params["wq"].reshape(C, n_heads, D).transpose(1, 0, 2).astype(bf16)  # (H, C, D)
    wkh = params["wk"].reshape(C, n_heads, D).transpose(1, 0, 2).astype(bf16)
    wvh = params["wv"].reshape(C, n_heads, D).transpose(1, 0, 2).astype(bf16)
    wph = params["wp"].reshape(n_heads, D, C).astype(bf16)                     # (H, D, C)
    bqh = params["bq"].reshape(n_heads, 1, D)                                  # (H, 1, D) f32
    bkh = params["bk"].reshape(n_heads, 1, D)
    bvh = params["bv"].reshape(n_heads, 1, D)
    w1 = params["w1"].astype(bf16)
    w2 = params["w2"].astype(bf16)

    kernel = functools.partial(_block_kernel, n_heads=n_heads, head_dim=D, eps=eps)

    def const(shape):
        return pl.BlockSpec(shape, lambda b, h, _s=shape: tuple(0 for _ in _s))

    def per_head(shape):
        return pl.BlockSpec(shape,
                            lambda b, h, _s=shape: (h,) + tuple(0 for _ in _s[1:]))

    in_specs = [
        pl.BlockSpec((batch_block, T, C), lambda b, h: (b, 0, 0)),   # x
        per_head((1, C, D)), per_head((1, 1, D)),                    # wq, bq
        per_head((1, C, D)), per_head((1, 1, D)),                    # wk, bk
        per_head((1, C, D)), per_head((1, 1, D)),                    # wv, bv
        per_head((1, D, C)), const((1, C)),                          # wp, bp
        const((1, C)), const((1, C)),                                # ln1 g, b
        const((C, M)), const((1, M)),                                # mlp w1, b1
        const((M, C)), const((1, C)),                                # mlp w2, b2
        const((1, C)), const((1, C)),                                # ln2 g, b
    ]

    return pl.pallas_call(
        kernel,
        out_shape=jax.ShapeDtypeStruct((B, T, C), jnp.float32),
        grid_spec=pltpu.PrefetchScalarGridSpec(
            num_scalar_prefetch=0,
            grid=(nb, n_heads),                      # heads innermost (reduction)
            in_specs=in_specs,
            out_specs=pl.BlockSpec((batch_block, T, C), lambda b, h: (b, 0, 0)),
            scratch_shapes=[pltpu.VMEM((batch_block * T, C), jnp.float32)],
        ),
        compiler_params=pltpu.CompilerParams(
            # batch blocks are independent; head axis carries the accumulator.
            dimension_semantics=("parallel", "arbitrary"),
            # At production C/mlp sizes (esp. v7x 64 MiB VMEM), raise
            # vmem_limit_bytes here and/or stream the MLP weights too.
        ),
    )(
        x,
        wqh, bqh, wkh, bkh, wvh, bvh, wph, params["bp"],
        params["ln1_g"], params["ln1_b"],
        w1, params["b1"], w2, params["b2"],
        params["ln2_g"], params["ln2_b"],
    )


def _reference_forward(x, p, n_heads, eps=1e-5):
    """Pure-JAX f32 reference mirroring the PyTorch module (dropout = identity)."""
    B, T, C = x.shape
    D = C // n_heads

    def lin(a, w, b):
        return a @ w + b

    q = lin(x, p["wq"], p["bq"]).reshape(B, T, n_heads, D).transpose(0, 2, 1, 3)
    k = lin(x, p["wk"], p["bk"]).reshape(B, T, n_heads, D).transpose(0, 2, 1, 3)
    v = lin(x, p["wv"], p["bv"]).reshape(B, T, n_heads, D).transpose(0, 2, 1, 3)
    s = jnp.einsum("bhtd,bhsd->bhts", q, k) / math.sqrt(D)
    mask = jnp.tril(jnp.ones((T, T), bool))
    s = jnp.where(mask[None, None], s, -jnp.inf)
    a = jax.nn.softmax(s, axis=-1)
    o = jnp.einsum("bhts,bhsd->bhtd", a, v).transpose(0, 2, 1, 3).reshape(B, T, C)
    o = lin(o, p["wp"], p["bp"])
    x = x + o

    def ln(z, g, b):
        mu = z.mean(-1, keepdims=True)
        var = ((z - mu) ** 2).mean(-1, keepdims=True)
        return (z - mu) / jnp.sqrt(var + eps) * g + b

    x = ln(x, p["ln1_g"], p["ln1_b"])
    h = jnp.maximum(lin(x, p["w1"], p["b1"]), 0.0)
    x = x + lin(h, p["w2"], p["b2"])
    x = ln(x, p["ln2_g"], p["ln2_b"])
    return x


def make_params(key, h_dim, mlp_dim):
    ks = jax.random.split(key, 12)
    scale = 0.02

    def w(k, shape):
        return (scale * jax.random.normal(k, shape)).astype(jnp.float32)

    return {
        # Linear weights stored as (in, out); PyTorch stores (out, in).
        "wq": w(ks[0], (h_dim, h_dim)), "bq": w(ks[1], (1, h_dim)),
        "wk": w(ks[2], (h_dim, h_dim)), "bk": w(ks[3], (1, h_dim)),
        "wv": w(ks[4], (h_dim, h_dim)), "bv": w(ks[5], (1, h_dim)),
        "wp": w(ks[6], (h_dim, h_dim)), "bp": w(ks[7], (1, h_dim)),
        "ln1_g": jnp.ones((1, h_dim), jnp.float32),
        "ln1_b": jnp.zeros((1, h_dim), jnp.float32),
        "w1": w(ks[8], (h_dim, mlp_dim)), "b1": w(ks[9], (1, mlp_dim)),
        "w2": w(ks[10], (mlp_dim, h_dim)), "b2": w(ks[11], (1, h_dim)),
        "ln2_g": jnp.ones((1, h_dim), jnp.float32),
        "ln2_b": jnp.zeros((1, h_dim), jnp.float32),
    }


if __name__ == "__main__":
    B, T, C = 2, 8, 32          # batch, seq (== max_T), hidden
    n_heads = 4
    mlp_dim = 64

    key = jax.random.PRNGKey(0)
    kx, kp = jax.random.split(key)
    x = jax.random.normal(kx, (B, T, C), dtype=jnp.float32)
    params = make_params(kp, C, mlp_dim)

    out = jax.block_until_ready(block_forward(x, params, n_heads=n_heads))

    ref = _reference_forward(x, params, n_heads)
    assert out.shape == (B, T, C)
    # bf16 matmul operands (f32 accumulation) => compare at bf16-level tolerance.
    assert jnp.allclose(out, ref, atol=1e-2, rtol=1e-2), "mismatch vs JAX reference"

    print("KERNEL_OK")
</pallas_src>

<mosaic_0001>
module attributes {stable_mosaic.version = 11 : i64} {
  func.func @_block_kernel(%arg0: i32, %arg1: i32, %arg2: memref<1x8x32xf32, #tpu.memory_space<vmem>>, %arg3: memref<1x32x8xbf16, #tpu.memory_space<vmem>>, %arg4: memref<1x1x8xf32, #tpu.memory_space<vmem>>, %arg5: memref<1x32x8xbf16, #tpu.memory_space<vmem>>, %arg6: memref<1x1x8xf32, #tpu.memory_space<vmem>>, %arg7: memref<1x32x8xbf16, #tpu.memory_space<vmem>>, %arg8: memref<1x1x8xf32, #tpu.memory_space<vmem>>, %arg9: memref<1x8x32xbf16, #tpu.memory_space<vmem>>, %arg10: memref<1x32xf32, #tpu.memory_space<vmem>>, %arg11: memref<1x32xf32, #tpu.memory_space<vmem>>, %arg12: memref<1x32xf32, #tpu.memory_space<vmem>>, %arg13: memref<32x64xbf16, #tpu.memory_space<vmem>>, %arg14: memref<1x64xf32, #tpu.memory_space<vmem>>, %arg15: memref<64x32xbf16, #tpu.memory_space<vmem>>, %arg16: memref<1x32xf32, #tpu.memory_space<vmem>>, %arg17: memref<1x32xf32, #tpu.memory_space<vmem>>, %arg18: memref<1x32xf32, #tpu.memory_space<vmem>>, %arg19: memref<1x8x32xf32, #tpu.memory_space<vmem>>, %arg20: memref<8x32xf32, #tpu.memory_space<vmem>>) attributes {dimension_semantics = [#tpu.dimension_semantics<parallel>, #tpu.dimension_semantics<arbitrary>], iteration_bounds = array<i64: 2, 4>, scalar_prefetch = 0 : i64, scratch_operands = 1 : i64, tpu.core_type = #tpu.core_type<tc>, window_params = [{transform_indices = @transform_0, window_bounds = array<i64: 1, 8, 32>}, {transform_indices = @transform_1, window_bounds = array<i64: 1, 32, 8>}, {transform_indices = @transform_2, window_bounds = array<i64: 1, 1, 8>}, {transform_indices = @transform_3, window_bounds = array<i64: 1, 32, 8>}, {transform_indices = @transform_4, window_bounds = array<i64: 1, 1, 8>}, {transform_indices = @transform_5, window_bounds = array<i64: 1, 32, 8>}, {transform_indices = @transform_6, window_bounds = array<i64: 1, 1, 8>}, {transform_indices = @transform_7, window_bounds = array<i64: 1, 8, 32>}, {pipeline_mode = #tpu.pipeline_mode<synchronous>, transform_indices = @transform_8, window_bounds = array<i64: 1, 32>}, {pipeline_mode = #tpu.pipeline_mode<synchronous>, transform_indices = @transform_9, window_bounds = array<i64: 1, 32>}, {pipeline_mode = #tpu.pipeline_mode<synchronous>, transform_indices = @transform_10, window_bounds = array<i64: 1, 32>}, {pipeline_mode = #tpu.pipeline_mode<synchronous>, transform_indices = @transform_11, window_bounds = array<i64: 32, 64>}, {pipeline_mode = #tpu.pipeline_mode<synchronous>, transform_indices = @transform_12, window_bounds = array<i64: 1, 64>}, {pipeline_mode = #tpu.pipeline_mode<synchronous>, transform_indices = @transform_13, window_bounds = array<i64: 64, 32>}, {pipeline_mode = #tpu.pipeline_mode<synchronous>, transform_indices = @transform_14, window_bounds = array<i64: 1, 32>}, {pipeline_mode = #tpu.pipeline_mode<synchronous>, transform_indices = @transform_15, window_bounds = array<i64: 1, 32>}, {pipeline_mode = #tpu.pipeline_mode<synchronous>, transform_indices = @transform_16, window_bounds = array<i64: 1, 32>}, {transform_indices = @transform_17, window_bounds = array<i64: 1, 8, 32>}]} {
    %c0_i32 = arith.constant 0 : i32
    %0 = arith.cmpi eq, %arg1, %c0_i32 : i32
    %1 = arith.extui %0 : i1 to i32
    %c0_i32_0 = arith.constant 0 : i32
    %2 = arith.cmpi ne, %1, %c0_i32_0 : i32
    scf.if %2 {
      %cst_38 = arith.constant 0.000000e+00 : f32
      %65 = vector.broadcast %cst_38 : f32 to vector<8x32xf32>
      %c0_39 = arith.constant 0 : index
      %c0_40 = arith.constant 0 : index
      %66 = vector.load %arg20[%c0_39, %c0_40] : memref<8x32xf32, #tpu.memory_space<vmem>>, vector<8x32xf32>
      tpu.vector_store %arg20[%c0_39, %c0_40], %65 {strides = array<i32>} : memref<8x32xf32, #tpu.memory_space<vmem>>, vector<8x32xf32>,
    } else {
    }
    %c0 = arith.constant 0 : index
    %c0_1 = arith.constant 0 : index
    %c0_2 = arith.constant 0 : index
    %3 = vector.load %arg2[%c0, %c0_1, %c0_2] : memref<1x8x32xf32, #tpu.memory_space<vmem>>, vector<1x8x32xf32>
    %4 = vector.shape_cast %3 : vector<1x8x32xf32> to vector<8x32xf32>
    %5 = arith.truncf %4 : vector<8x32xf32> to vector<8x32xbf16>
    %c0_3 = arith.constant 0 : index
    %c0_4 = arith.constant 0 : index
    %c0_5 = arith.constant 0 : index
    %6 = vector.load %arg3[%c0_3, %c0_4, %c0_5] : memref<1x32x8xbf16, #tpu.memory_space<vmem>>, vector<1x32x8xbf16>
    %7 = vector.shape_cast %6 : vector<1x32x8xbf16> to vector<32x8xbf16>
    %cst = arith.constant dense<0.000000e+00> : vector<8x8xf32>
    %8 = tpu.matmul %5, %7, %cst {dimension_numbers = #tpu.dot_dimension_numbers<[1], [0], [0], [1], [0, 0, 1, 1], [], []>} : vector<8x32xbf16>, vector<32x8xbf16>, vector<8x8xf32> -> vector<8x8xf32>
    %c0_6 = arith.constant 0 : index
    %c0_7 = arith.constant 0 : index
    %c0_8 = arith.constant 0 : index
    %9 = vector.load %arg4[%c0_6, %c0_7, %c0_8] : memref<1x1x8xf32, #tpu.memory_space<vmem>>, vector<1x1x8xf32>
    %10 = vector.shape_cast %9 : vector<1x1x8xf32> to vector<1x8xf32>
    %11 = vector.broadcast %10 : vector<1x8xf32> to vector<8x8xf32>
    %12 = arith.addf %8, %11 : vector<8x8xf32>
    %c0_9 = arith.constant 0 : index
    %c0_10 = arith.constant 0 : index
    %c0_11 = arith.constant 0 : index
    %13 = vector.load %arg5[%c0_9, %c0_10, %c0_11] : memref<1x32x8xbf16, #tpu.memory_space<vmem>>, vector<1x32x8xbf16>
    %14 = vector.shape_cast %13 : vector<1x32x8xbf16> to vector<32x8xbf16>
    %cst_12 = arith.constant dense<0.000000e+00> : vector<8x8xf32>
    %15 = tpu.matmul %5, %14, %cst_12 {dimension_numbers = #tpu.dot_dimension_numbers<[1], [0], [0], [1], [0, 0, 1, 1], [], []>} : vector<8x32xbf16>, vector<32x8xbf16>, vector<8x8xf32> -> vector<8x8xf32>
    %c0_13 = arith.constant 0 : index
    %c0_14 = arith.constant 0 : index
    %c0_15 = arith.constant 0 : index
    %16 = vector.load %arg6[%c0_13, %c0_14, %c0_15] : memref<1x1x8xf32, #tpu.memory_space<vmem>>, vector<1x1x8xf32>
    %17 = vector.shape_cast %16 : vector<1x1x8xf32> to vector<1x8xf32>
    %18 = vector.broadcast %17 : vector<1x8xf32> to vector<8x8xf32>
    %19 = arith.addf %15, %18 : vector<8x8xf32>
    %c0_16 = arith.constant 0 : index
    %c0_17 = arith.constant 0 : index
    %c0_18 = arith.constant 0 : index
    %20 = vector.load %arg7[%c0_16, %c0_17, %c0_18] : memref<1x32x8xbf16, #tpu.memory_space<vmem>>, vector<1x32x8xbf16>
    %21 = vector.shape_cast %20 : vector<1x32x8xbf16> to vector<32x8xbf16>
    %cst_19 = arith.constant dense<0.000000e+00> : vector<8x8xf32>
    %22 = tpu.matmul %5, %21, %cst_19 {dimension_numbers = #tpu.dot_dimension_numbers<[1], [0], [0], [1], [0, 0, 1, 1], [], []>} : vector<8x32xbf16>, vector<32x8xbf16>, vector<8x8xf32> -> vector<8x8xf32>
    %c0_20 = arith.constant 0 : index
    %c0_21 = arith.constant 0 : index
    %c0_22 = arith.constant 0 : index
    %23 = vector.load %arg8[%c0_20, %c0_21, %c0_22] : memref<1x1x8xf32, #tpu.memory_space<vmem>>, vector<1x1x8xf32>
    %24 = vector.shape_cast %23 : vector<1x1x8xf32> to vector<1x8xf32>
    %25 = vector.broadcast %24 : vector<1x8xf32> to vector<8x8xf32>
    %26 = arith.addf %22, %25 : vector<8x8xf32>
    %27 = vector.shape_cast %12 : vector<8x8xf32> to vector<1x8x8xf32>
    %28 = arith.truncf %27 : vector<1x8x8xf32> to vector<1x8x8xbf16>
    %29 = vector.shape_cast %19 : vector<8x8xf32> to vector<1x8x8xf32>
    %30 = arith.truncf %29 : vector<1x8x8xf32> to vector<1x8x8xbf16>
    %31 = vector.shape_cast %26 : vector<8x8xf32> to vector<1x8x8xf32>
    %32 = arith.truncf %31 : vector<1x8x8xf32> to vector<1x8x8xbf16>
    "tpu.trace_start"() <{level = 10 : i32, message = "btd,bsd->bts"}> : () -> ()
    %cst_23 = arith.constant dense<0.000000e+00> : vector<1x8x8xf32>
    %33 = tpu.matmul %28, %30, %cst_23 {dimension_numbers = #tpu.dot_dimension_numbers<[2], [2], [1], [1], [0, 0, 0, 1, 1, 1], [0], [0]>} : vector<1x8x8xbf16>, vector<1x8x8xbf16>, vector<1x8x8xf32> -> vector<1x8x8xf32>
    "tpu.trace_stop"() : () -> ()
    %cst_24 = arith.constant 0.353553385 : f32
    %34 = vector.broadcast %cst_24 : f32 to vector<1x8x8xf32>
    %35 = arith.mulf %33, %34 : vector<1x8x8xf32>
    %36 = tpu.iota {dimensions = array<i32: 0>} : vector<8x8xi32>
    %37 = tpu.iota {dimensions = array<i32: 1>} : vector<8x8xi32>
    %38 = arith.cmpi sge, %36, %37 : vector<8x8xi32>
    %39 = vector.shape_cast %38 : vector<8x8xi1> to vector<1x8x8xi1>
    %cst_25 = arith.constant 0xFF800000 : f32
    %40 = vector.broadcast %cst_25 : f32 to vector<1x8x8xf32>
    %41 = arith.select %39, %35, %40 : vector<1x8x8xi1>, vector<1x8x8xf32>
    %cst_26 = arith.constant dense<0xFF800000> : vector<1x8xf32>
    %42 = vector.multi_reduction <maximumf>, %41, %cst_26 [2] : vector<1x8x8xf32> to vector<1x8xf32>
    %43 = vector.shape_cast %42 : vector<1x8xf32> to vector<1x8x1xf32>
    %44 = vector.broadcast %43 : vector<1x8x1xf32> to vector<1x8x8xf32>
    %45 = arith.subf %41, %44 : vector<1x8x8xf32>
    %46 = math.exp %45 : vector<1x8x8xf32>
    %cst_27 = arith.constant dense<0.000000e+00> : vector<1x8xf32>
    %47 = vector.multi_reduction <add>, %46, %cst_27 [2] : vector<1x8x8xf32> to vector<1x8xf32>
    %48 = vector.shape_cast %47 : vector<1x8xf32> to vector<1x8x1xf32>
    %49 = tpu.reciprocal %48 {approx = true} : vector<1x8x1xf32> -> vector<1x8x1xf32>
    %50 = vector.broadcast %49 : vector<1x8x1xf32> to vector<1x8x8xf32>
    %51 = arith.mulf %46, %50 : vector<1x8x8xf32>
    %52 = arith.truncf %51 : vector<1x8x8xf32> to vector<1x8x8xbf16>
    "tpu.trace_start"() <{level = 10 : i32, message = "bts,bsd->btd"}> : () -> ()
    %cst_28 = arith.constant dense<0.000000e+00> : vector<1x8x8xf32>
    %53 = tpu.matmul %52, %32, %cst_28 {dimension_numbers = #tpu.dot_dimension_numbers<[2], [1], [1], [2], [0, 0, 0, 1, 1, 2], [0], [0]>} : vector<1x8x8xbf16>, vector<1x8x8xbf16>, vector<1x8x8xf32> -> vector<1x8x8xf32>
    "tpu.trace_stop"() : () -> ()
    %54 = vector.shape_cast %53 : vector<1x8x8xf32> to vector<8x8xf32>
    %55 = arith.truncf %54 : vector<8x8xf32> to vector<8x8xbf16>
    %c0_29 = arith.constant 0 : index
    %c0_30 = arith.constant 0 : index
    %56 = vector.load %arg20[%c0_29, %c0_30] : memref<8x32xf32, #tpu.memory_space<vmem>>, vector<8x32xf32>
    %c0_31 = arith.constant 0 : index
    %c0_32 = arith.constant 0 : index
    %c0_33 = arith.constant 0 : index
    %57 = vector.load %arg9[%c0_31, %c0_32, %c0_33] : memref<1x8x32xbf16, #tpu.memory_space<vmem>>, vector<1x8x32xbf16>
    %58 = vector.shape_cast %57 : vector<1x8x32xbf16> to vector<8x32xbf16>
    %cst_34 = arith.constant dense<0.000000e+00> : vector<8x32xf32>
    %59 = tpu.matmul %55, %58, %cst_34 {dimension_numbers = #tpu.dot_dimension_numbers<[1], [0], [0], [1], [0, 0, 1, 1], [], []>} : vector<8x8xbf16>, vector<8x32xbf16>, vector<8x32xf32> -> vector<8x32xf32>
    %60 = arith.addf %56, %59 : vector<8x32xf32>
    %c0_35 = arith.constant 0 : index
    %c0_36 = arith.constant 0 : index
    %61 = vector.load %arg20[%c0_35, %c0_36] : memref<8x32xf32, #tpu.memory_space<vmem>>, vector<8x32xf32>
    tpu.vector_store %arg20[%c0_35, %c0_36], %60 {strides = array<i32>} : memref<8x32xf32, #tpu.memory_space<vmem>>, vector<8x32xf32>,
    %c3_i32 = arith.constant 3 : i32
    %62 = arith.cmpi eq, %arg1, %c3_i32 : i32
    %63 = arith.extui %62 : i1 to i32
    %c0_i32_37 = arith.constant 0 : i32
    %64 = arith.cmpi ne, %63, %c0_i32_37 : i32
    scf.if %64 {
      %c0_38 = arith.constant 0 : index
      %c0_39 = arith.constant 0 : index
      %65 = vector.load %arg20[%c0_38, %c0_39] : memref<8x32xf32, #tpu.memory_space<vmem>>, vector<8x32xf32>
      %c0_40 = arith.constant 0 : index
      %c0_41 = arith.constant 0 : index
      %66 = vector.load %arg10[%c0_40, %c0_41] : memref<1x32xf32, #tpu.memory_space<vmem>>, vector<1x32xf32>
      %67 = vector.broadcast %66 : vector<1x32xf32> to vector<8x32xf32>
      %68 = arith.addf %65, %67 : vector<8x32xf32>
      %69 = arith.addf %4, %68 : vector<8x32xf32>
      %cst_42 = arith.constant dense<0.000000e+00> : vector<8xf32>
      %70 = vector.multi_reduction <add>, %69, %cst_42 [1] : vector<8x32xf32> to vector<8xf32>
      %71 = vector.shape_cast %70 : vector<8xf32> to vector<8x1xf32>
      %cst_43 = arith.constant 3.200000e+01 : f32
      %72 = vector.broadcast %cst_43 : f32 to vector<8x1xf32>
      %73 = arith.divf %71, %72 : vector<8x1xf32>
      %74 = vector.broadcast %73 : vector<8x1xf32> to vector<8x32xf32>
      %75 = arith.subf %69, %74 : vector<8x32xf32>
      %76 = arith.mulf %75, %75 : vector<8x32xf32>
      %cst_44 = arith.constant dense<0.000000e+00> : vector<8xf32>
      %77 = vector.multi_reduction <add>, %76, %cst_44 [1] : vector<8x32xf32> to vector<8xf32>
      %78 = vector.shape_cast %77 : vector<8xf32> to vector<8x1xf32>
      %cst_45 = arith.constant 3.200000e+01 : f32
      %79 = vector.broadcast %cst_45 : f32 to vector<8x1xf32>
      %80 = arith.divf %78, %79 : vector<8x1xf32>
      %81 = vector.broadcast %73 : vector<8x1xf32> to vector<8x32xf32>
      %82 = arith.subf %69, %81 : vector<8x32xf32>
      %cst_46 = arith.constant 9.99999974E-6 : f32
      %83 = vector.broadcast %cst_46 : f32 to vector<8x1xf32>
      %84 = arith.addf %80, %83 : vector<8x1xf32>
      %85 = math.rsqrt %84 : vector<8x1xf32>
      %86 = vector.broadcast %85 : vector<8x1xf32> to vector<8x32xf32>
      %87 = arith.mulf %82, %86 : vector<8x32xf32>
      %c0_47 = arith.constant 0 : index
      %c0_48 = arith.constant 0 : index
      %88 = vector.load %arg11[%c0_47, %c0_48] : memref<1x32xf32, #tpu.memory_space<vmem>>, vector<1x32xf32>
      %89 = vector.broadcast %88 : vector<1x32xf32> to vector<8x32xf32>
      %90 = arith.mulf %87, %89 : vector<8x32xf32>
      %c0_49 = arith.constant 0 : index
      %c0_50 = arith.constant 0 : index
      %91 = vector.load %arg12[%c0_49, %c0_50] : memref<1x32xf32, #tpu.memory_space<vmem>>, vector<1x32xf32>
      %92 = vector.broadcast %91 : vector<1x32xf32> to vector<8x32xf32>
      %93 = arith.addf %90, %92 : vector<8x32xf32>
      %94 = arith.truncf %93 : vector<8x32xf32> to vector<8x32xbf16>
      %c0_51 = arith.constant 0 : index
      %c0_52 = arith.constant 0 : index
      %95 = vector.load %arg13[%c0_51, %c0_52] : memref<32x64xbf16, #tpu.memory_space<vmem>>, vector<32x64xbf16>
      %cst_53 = arith.constant dense<0.000000e+00> : vector<8x64xf32>
      %96 = tpu.matmul %94, %95, %cst_53 {dimension_numbers = #tpu.dot_dimension_numbers<[1], [0], [0], [1], [0, 0, 1, 1], [], []>} : vector<8x32xbf16>, vector<32x64xbf16>, vector<8x64xf32> -> vector<8x64xf32>
      %c0_54 = arith.constant 0 : index
      %c0_55 = arith.constant 0 : index
      %97 = vector.load %arg14[%c0_54, %c0_55] : memref<1x64xf32, #tpu.memory_space<vmem>>, vector<1x64xf32>
      %98 = vector.broadcast %97 : vector<1x64xf32> to vector<8x64xf32>
      %99 = arith.addf %96, %98 : vector<8x64xf32>
      %cst_56 = arith.constant 0.000000e+00 : f32
      %100 = vector.broadcast %cst_56 : f32 to vector<8x64xf32>
      %101 = arith.maximumf %99, %100 : vector<8x64xf32>
      %102 = arith.truncf %101 : vector<8x64xf32> to vector<8x64xbf16>
      %c0_57 = arith.constant 0 : index
      %c0_58 = arith.constant 0 : index
      %103 = vector.load %arg15[%c0_57, %c0_58] : memref<64x32xbf16, #tpu.memory_space<vmem>>, vector<64x32xbf16>
      %cst_59 = arith.constant dense<0.000000e+00> : vector<8x32xf32>
      %104 = tpu.matmul %102, %103, %cst_59 {dimension_numbers = #tpu.dot_dimension_numbers<[1], [0], [0], [1], [0, 0, 1, 1], [], []>} : vector<8x64xbf16>, vector<64x32xbf16>, vector<8x32xf32> -> vector<8x32xf32>
      %c0_60 = arith.constant 0 : index
      %c0_61 = arith.constant 0 : index
      %105 = vector.load %arg16[%c0_60, %c0_61] : memref<1x32xf32, #tpu.memory_space<vmem>>, vector<1x32xf32>
      %106 = vector.broadcast %105 : vector<1x32xf32> to vector<8x32xf32>
      %107 = arith.addf %104, %106 : vector<8x32xf32>
      %108 = arith.addf %93, %107 : vector<8x32xf32>
      %cst_62 = arith.constant dense<0.000000e+00> : vector<8xf32>
      %109 = vector.multi_reduction <add>, %108, %cst_62 [1] : vector<8x32xf32> to vector<8xf32>
      %110 = vector.shape_cast %109 : vector<8xf32> to vector<8x1xf32>
      %cst_63 = arith.constant 3.200000e+01 : f32
      %111 = vector.broadcast %cst_63 : f32 to vector<8x1xf32>
      %112 = arith.divf %110, %111 : vector<8x1xf32>
      %113 = vector.broadcast %112 : vector<8x1xf32> to vector<8x32xf32>
      %114 = arith.subf %108, %113 : vector<8x32xf32>
      %115 = arith.mulf %114, %114 : vector<8x32xf32>
      %cst_64 = arith.constant dense<0.000000e+00> : vector<8xf32>
      %116 = vector.multi_reduction <add>, %115, %cst_64 [1] : vector<8x32xf32> to vector<8xf32>
      %117 = vector.shape_cast %116 : vector<8xf32> to vector<8x1xf32>
      %cst_65 = arith.constant 3.200000e+01 : f32
      %118 = vector.broadcast %cst_65 : f32 to vector<8x1xf32>
      %119 = arith.divf %117, %118 : vector<8x1xf32>
      %120 = vector.broadcast %112 : vector<8x1xf32> to vector<8x32xf32>
      %121 = arith.subf %108, %120 : vector<8x32xf32>
      %cst_66 = arith.constant 9.99999974E-6 : f32
      %122 = vector.broadcast %cst_66 : f32 to vector<8x1xf32>
      %123 = arith.addf %119, %122 : vector<8x1xf32>
      %124 = math.rsqrt %123 : vector<8x1xf32>
      %125 = vector.broadcast %124 : vector<8x1xf32> to vector<8x32xf32>
      %126 = arith.mulf %121, %125 : vector<8x32xf32>
      %c0_67 = arith.constant 0 : index
      %c0_68 = arith.constant 0 : index
      %127 = vector.load %arg17[%c0_67, %c0_68] : memref<1x32xf32, #tpu.memory_space<vmem>>, vector<1x32xf32>
      %128 = vector.broadcast %127 : vector<1x32xf32> to vector<8x32xf32>
      %129 = arith.mulf %126, %128 : vector<8x32xf32>
      %c0_69 = arith.constant 0 : index
      %c0_70 = arith.constant 0 : index
      %130 = vector.load %arg18[%c0_69, %c0_70] : memref<1x32xf32, #tpu.memory_space<vmem>>, vector<1x32xf32>
      %131 = vector.broadcast %130 : vector<1x32xf32> to vector<8x32xf32>
      %132 = arith.addf %129, %131 : vector<8x32xf32>
      %133 = vector.shape_cast %132 : vector<8x32xf32> to vector<1x8x32xf32>
      %c0_71 = arith.constant 0 : index
      %c0_72 = arith.constant 0 : index
      %c0_73 = arith.constant 0 : index
      %134 = vector.load %arg19[%c0_71, %c0_72, %c0_73] : memref<1x8x32xf32, #tpu.memory_space<vmem>>, vector<1x8x32xf32>
      tpu.vector_store %arg19[%c0_71, %c0_72, %c0_73], %133 {strides = array<i32>} : memref<1x8x32xf32, #tpu.memory_space<vmem>>, vector<1x8x32xf32>,
    } else {
    }
    return
  }
  func.func @transform_0(%arg0: i32, %arg1: i32) -> (i32, i32, i32) {
    %c0_i32 = arith.constant 0 : i32
    %c0_i32_0 = arith.constant 0 : i32
    %c0_i32_1 = arith.constant 0 : i32
    return %arg0, %c0_i32, %c0_i32_0 : i32, i32, i32
  }
  func.func @transform_1(%arg0: i32, %arg1: i32) -> (i32, i32, i32) {
    %c0_i32 = arith.constant 0 : i32
    %c0_i32_0 = arith.constant 0 : i32
    %c0_i32_1 = arith.constant 0 : i32
    return %arg1, %c0_i32, %c0_i32_0 : i32, i32, i32
  }
  func.func @transform_2(%arg0: i32, %arg1: i32) -> (i32, i32, i32) {
    %c0_i32 = arith.constant 0 : i32
    %c0_i32_0 = arith.constant 0 : i32
    %c0_i32_1 = arith.constant 0 : i32
    return %arg1, %c0_i32, %c0_i32_0 : i32, i32, i32
  }
  func.func @transform_3(%arg0: i32, %arg1: i32) -> (i32, i32, i32) {
    %c0_i32 = arith.constant 0 : i32
    %c0_i32_0 = arith.constant 0 : i32
    %c0_i32_1 = arith.constant 0 : i32
    return %arg1, %c0_i32, %c0_i32_0 : i32, i32, i32
  }
  func.func @transform_4(%arg0: i32, %arg1: i32) -> (i32, i32, i32) {
    %c0_i32 = arith.constant 0 : i32
    %c0_i32_0 = arith.constant 0 : i32
    %c0_i32_1 = arith.constant 0 : i32
    return %arg1, %c0_i32, %c0_i32_0 : i32, i32, i32
  }
  func.func @transform_5(%arg0: i32, %arg1: i32) -> (i32, i32, i32) {
    %c0_i32 = arith.constant 0 : i32
    %c0_i32_0 = arith.constant 0 : i32
    %c0_i32_1 = arith.constant 0 : i32
    return %arg1, %c0_i32, %c0_i32_0 : i32, i32, i32
  }
  func.func @transform_6(%arg0: i32, %arg1: i32) -> (i32, i32, i32) {
    %c0_i32 = arith.constant 0 : i32
    %c0_i32_0 = arith.constant 0 : i32
    %c0_i32_1 = arith.constant 0 : i32
    return %arg1, %c0_i32, %c0_i32_0 : i32, i32, i32
  }
  func.func @transform_7(%arg0: i32, %arg1: i32) -> (i32, i32, i32) {
    %c0_i32 = arith.constant 0 : i32
    %c0_i32_0 = arith.constant 0 : i32
    %c0_i32_1 = arith.constant 0 : i32
    return %arg1, %c0_i32, %c0_i32_0 : i32, i32, i32
  }
  func.func @transform_8(%arg0: i32, %arg1: i32) -> (i32, i32) {
    %c0_i32 = arith.constant 0 : i32
    %c0_i32_0 = arith.constant 0 : i32
    %c0_i32_1 = arith.constant 0 : i32
    return %c0_i32, %c0_i32_0 : i32, i32
  }
  func.func @transform_9(%arg0: i32, %arg1: i32) -> (i32, i32) {
    %c0_i32 = arith.constant 0 : i32
    %c0_i32_0 = arith.constant 0 : i32
    %c0_i32_1 = arith.constant 0 : i32
    return %c0_i32, %c0_i32_0 : i32, i32
  }
  func.func @transform_10(%arg0: i32, %arg1: i32) -> (i32, i32) {
    %c0_i32 = arith.constant 0 : i32
    %c0_i32_0 = arith.constant 0 : i32
    %c0_i32_1 = arith.constant 0 : i32
    return %c0_i32, %c0_i32_0 : i32, i32
  }
  func.func @transform_11(%arg0: i32, %arg1: i32) -> (i32, i32) {
    %c0_i32 = arith.constant 0 : i32
    %c0_i32_0 = arith.constant 0 : i32
    %c0_i32_1 = arith.constant 0 : i32
    return %c0_i32, %c0_i32_0 : i32, i32
  }
  func.func @transform_12(%arg0: i32, %arg1: i32) -> (i32, i32) {
    %c0_i32 = arith.constant 0 : i32
    %c0_i32_0 = arith.constant 0 : i32
    %c0_i32_1 = arith.constant 0 : i32
    return %c0_i32, %c0_i32_0 : i32, i32
  }
  func.func @transform_13(%arg0: i32, %arg1: i32) -> (i32, i32) {
    %c0_i32 = arith.constant 0 : i32
    %c0_i32_0 = arith.constant 0 : i32
    %c0_i32_1 = arith.constant 0 : i32
    return %c0_i32, %c0_i32_0 : i32, i32
  }
  func.func @transform_14(%arg0: i32, %arg1: i32) -> (i32, i32) {
    %c0_i32 = arith.constant 0 : i32
    %c0_i32_0 = arith.constant 0 : i32
    %c0_i32_1 = arith.constant 0 : i32
    return %c0_i32, %c0_i32_0 : i32, i32
  }
  func.func @transform_15(%arg0: i32, %arg1: i32) -> (i32, i32) {
    %c0_i32 = arith.constant 0 : i32
    %c0_i32_0 = arith.constant 0 : i32
    %c0_i32_1 = arith.constant 0 : i32
    return %c0_i32, %c0_i32_0 : i32, i32
  }
  func.func @transform_16(%arg0: i32, %arg1: i32) -> (i32, i32) {
    %c0_i32 = arith.constant 0 : i32
    %c0_i32_0 = arith.constant 0 : i32
    %c0_i32_1 = arith.constant 0 : i32
    return %c0_i32, %c0_i32_0 : i32, i32
  }
  func.func @transform_17(%arg0: i32, %arg1: i32) -> (i32, i32, i32) {
    %c0_i32 = arith.constant 0 : i32
    %c0_i32_0 = arith.constant 0 : i32
    %c0_i32_1 = arith.constant 0 : i32
    return %arg0, %c0_i32, %c0_i32_0 : i32, i32, i32
  }
}

</mosaic_0001>

<bundles_post_ra>
// kernel: tpu_custom_call.1
= control target key start
LH: loop header
LB: loop body
LE: loop exit
PB: predicated region body
PF: predicated region fallthrough
CT: control target
= control target key end

     0   :  { %s1814_s0 = inlined_call_operand.vmem [shape: f32[2,8,32], index: 0, kind: input, shape index: {}]   ;;  %s1815_s1 = inlined_call_operand.vmem [shape: bf16[4,32,8], index: 1, kind: input, shape index: {}]   ;;  %s1816_s2 = inlined_call_operand.vmem [shape: f32[4,1,8], index: 2, kind: input, shape index: {}]   ;;  %s1817_s3 = inlined_call_operand.vmem [shape: bf16[4,32,8], index: 3, kind: input, shape index: {}]   ;;  %s1818_s4 = inlined_call_operand.vmem [shape: f32[4,1,8], index: 4, kind: input, shape index: {}]   ;;  %s1819_s5 = inlined_call_operand.vmem [shape: bf16[4,32,8], index: 5, kind: input, shape index: {}]   ;;  %s1820_s6 = inlined_call_operand.vmem [shape: f32[4,1,8], index: 6, kind: input, shape index: {}]   ;;  %s1821_s7 = inlined_call_operand.vmem [shape: bf16[4,8,32], index: 7, kind: input, shape index: {}]   ;;  %s1822_s8 = inlined_call_operand.vmem [shape: f32[1,32], index: 8, kind: input, shape index: {}]   ;;  %s1823_s9 = inlined_call_operand.vmem [shape: f32[1,32], index: 9, kind: input, shape index: {}]   ;;  %s1824_s10 = inlined_call_operand.vmem [shape: f32[1,32], index: 10, kind: input, shape index: {}]   ;;  %s1825_s11 = inlined_call_operand.vmem [shape: bf16[32,64], index: 11, kind: input, shape index: {}]   ;;  %s1826_s12 = inlined_call_operand.vmem [shape: f32[1,64], index: 12, kind: input, shape index: {}]   ;;  %s1827_s13 = inlined_call_operand.vmem [shape: bf16[64,32], index: 13, kind: input, shape index: {}]   ;;  %s1828_s14 = inlined_call_operand.vmem [shape: f32[1,32], index: 14, kind: input, shape index: {}]   ;;  %s1829_s15 = inlined_call_operand.vmem [shape: f32[1,32], index: 15, kind: input, shape index: {}]   ;;  %s1830_s16 = inlined_call_operand.vmem [shape: f32[1,32], index: 16, kind: input, shape index: {}]   ;;  %s1831_s17 = inlined_call_operand.hbm [shape: f32[2,8,32], index: 17, kind: output, shape index: {}]  }
   0x1   :  { %1847 = sst [smem:[#allocation18_spill]] %s1814_s0 }
   0x2   :  { %1848 = sst [smem:[#allocation19_spill]] %s1815_s1 }
   0x3   :  { %1849 = sst [smem:[#allocation20_spill]] %s1823_s9 }
   0x4   :  { %1850 = sst [smem:[#allocation21_spill]] %s1824_s10 }
   0x5   :  { %1851 = sst [smem:[#allocation22_spill]] %s1826_s12 }
   0x6   :  { %1852 = sst [smem:[#allocation23_spill]] %s1827_s13 }
   0x7   :  { %1853 = sst [smem:[#allocation24_spill]] %s1828_s14 }
   0x8   :  { %1854 = sst [smem:[#allocation25_spill]] %s1829_s15 }
   0x9   :  { %1855 = sst [smem:[#allocation26_spill]] %s1830_s16 }
   0xa   :  { %1856 = sst [smem:[#allocation27_spill]] %s1831_s17 }
   0xb   :  { %22 = vsyncpa [#allocation4], 0 }
   0xc   :  { %24 = vsyncpa [#allocation4 + $0x1], 0  ;;  %s1582_s24 = smov 0   ;;  %s1584_s25 = smov 0  }
   0xd   :  { %s1586_s26 = smov 0   ;;  %s1588_s27 = smov 0  }
   0xe   :  { %s1590_s28 = smov 0   ;;  %s1592_s29 = smov 0  }
   0xf   :  { %s1594_s0 = smov 0   ;;  %s1596_s30 = smov 0  }
  0x10 LB: > { %1857 = sst [smem:[#allocation6_spill]] %s1460_s24  ;;  %s1210_s18 = sadd.s32 4294967295, %s1488_s30   ;;  %s1488_s30 = sphi %s1596_s30, %s30_s30   ;;  %s1484_s0 = sphi %s1594_s0, %s1894_s0   ;;  %s1480_s29 = sphi %s1592_s29, %s1893_s29   ;;  %s1476_s28 = sphi %s1590_s28, %s1892_s28   ;;  %s1472_s27 = sphi %s1588_s27, %s1891_s27   ;;  %s1468_s26 = sphi %s1586_s26, %s1890_s26   ;;  %s1464_s25 = sphi %s1584_s25, %s1889_s25   ;;  %s1460_s24 = sphi %s1582_s24, %s1888_s24  }
  0x11   : > { %1858 = sst [smem:[#allocation7_spill]] %s1464_s25  ;;  %s1211_s19 = sadd.s32 4294967294, %s1488_s30  }
  0x12   : > { %1859 = sst [smem:[#allocation8_spill]] %s1468_s26  ;;  %s39_s1 = sadd.s32 1, %s1480_s29 }
  0x13   : > { %1860 = sst [smem:[#allocation9_spill]] %s1476_s28  ;;  %p40_p0 = scmp.ge.s32.totalorder %s39_s1, 4 }
  0x14   : > { %1861 = sst [smem:[#allocation10_spill]] %s1480_s29  ;;  %s42_s20 = sadd.s32 1, %s1484_s0 }
  0x15   : > { %1862 = sst [smem:[#allocation11_spill]] %s1484_s0  ;;  %p456_p1 = scmp.ne.s32.totalorder %s1468_s26, %s1464_s25 }
  0x16   : > { %1863 = sst [smem:[#allocation12_spill]] %s1488_s30  ;;  %p457_p2 = scmp.eq.s32.totalorder %s1210_s18, 7 }
  0x17   : > { %s1896_s1 = smov (%p40_p0, %s39_s1), 0  ;;  %s1898_s20 = smov (!%p40_p0, %s42_s20), %s1484_s0 }
  0x18   : > { %1864 = sst [smem:[#allocation13_spill]] %s1896_s1  ;;  %p1631_p3 = por %p457_p2, %p456_p1 }
  0x19   : > { %p462_p4 = scmp.ne.s32.totalorder %s1464_s25, %s1460_s24  ;;  %p44_p5 = scmp.ge.s32.totalorder %s1898_s20, 2 }
  0x1a   : > { %s1865_s21 = scalar_select %p1631_p3, 1, 0 }
  0x1b   : > { %p463_p6 = scmp.eq.s32.totalorder %s1211_s19, 7  ;;  %p1214_p7 = scmp.ge.s32.totalorder %s1488_s30, 1 }
  0x1c   : > { %1866 = sst [smem:[#allocation14_spill]] %s1865_s21  ;;  %p564_p8 = scmp.lt.s32.totalorder %s1488_s30, 9 }
  0x1d   : > { %s1900_s20 = smov (%p44_p5, %s1898_s20), 0  ;;  %p1641_p9 = por %p463_p6, %p462_p4 }
  0x1e   : > { %1867 = sst [smem:[#allocation15_spill]] %s1900_s20  ;;  %p565_p10 = pnand %p1214_p7, %p564_p8 }
  0x1f   : > { %s1868_s22 = scalar_select %p1641_p9, 1, 0 }
  0x20   : > { %s443_s23 = ssub.s32 %s1484_s0, %s1900_s20  ;;  %s446_s18 = sadd.s32 1, %s1468_s26 }
  0x21   : > { %1869 = sst [smem:[#allocation16_spill]] %s1868_s22  ;;  %p444_p11 = scmp.eq.s32.totalorder %s443_s23, 0 }
  0x22   : > { %568 = sbr.rel (%p565_p10) target bundleno = 1684 (0x694), region = 88  ;;  %s1841_s19 = sand.u32 (!%p565_p10), 1, %s1464_s25  }
  0x23   : > { %s1649_s1 = scalar_select %p444_p11, %s1468_s26, %s446_s18  }
  0x24   : > { %p643_p12 = scmp.lt.s32.totalorder (!%p565_p10), %s1476_s28, 1  ;;  %s1655_s29 = sshll.u32 (!%p565_p10), %s1841_s19, 3 }
  0x25   : > { %1870 = sst [smem:[#allocation17_spill]] %s1649_s1  ;;  %p647_p13 = scmp.lt.s32.totalorder (!%p565_p10), %s1472_s27, 3 }
  0x26   : > { %s1871_s1 = sld [smem:[#allocation18_spill]] (!%p565_p10)  ;;  %s642_s14 = scalar_lea.vmem (!%p565_p10), [#allocation3], %s1655_s29 }
  0x27   : > { %s644_s22 = scalar_select %p643_p12, %s1476_s28, 1 }
  0x28   : > { %s1660_s20 = scalar_select %p647_p13, %s1472_s27, 3 }
  0x29   : > { %s1216_s23 = sshll.u32 %s644_s22, 3  ;;  %s1872_s19 = sld [smem:[#allocation19_spill]] }
  0x2a   : > { %s1286_s24 = sshll.u32 %s1660_s20, 4  ;;  %s654_s28 = scalar_lea.vmem %s1816_s2, %s1660_s20 }
  0x2b   : > { %s659_s12 = scalar_lea.vmem %s1817_s3, %s1286_s24  ;;  %s662_s22 = scalar_lea.vmem %s1818_s4, %s1660_s20 }
  0x2c   : > { %s646_s26 = scalar_lea.vmem %s1871_s1, %s1216_s23  ;;  %s1683_s1 = scalar_lea.vmem %s1819_s5, %s1286_s24 }
  0x2d   : > { %s670_s30 = scalar_lea.vmem %s1820_s6, %s1660_s20  ;;  %p1224_p0 = scmp.ne.s32.totalorder %s1472_s27, 0 }
  0x2f   : > { %s651_s21 = scalar_lea.vmem %s1872_s19, %s1286_s24  ;;  %s1223_s19 = sshll.u32 %s1660_s20, 2 }
  0x30   : > { %s1693_s18 = scalar_lea.vmem %s1821_s7, %s1223_s19  ;;  %679 = sbr.rel (%p1224_p0) target bundleno = 55 (0x37), region = 92 }
  0x35   : > { %vm680_vm0 = vcmask 261120   ;;  %v1490_v0 = vmov 0.0  }
  0x36   : > { %681 = vst.msk [vmem:[#allocation2] sm:$0xff] %vm680_vm0, %v1490_v0 }
  0x37 PF: > { %v1290_v1 = vld [vmem:[%s651_s21 + $0x8] sm:$0xff]  ;;  %v1289_v3 = vld [vmem:[%s651_s21] sm:$0xff]  ;;  %vm704_vm1 = vcmask 261120   ;;  %vm790_vm2 = vcmask 64512   ;;  %v811_v20 = vlaneseq  ;;  %vm832_vm4 = vcmask 1043456   ;;  %p1255_p1 = scmp.ne.s32.totalorder %s1472_s27, 3 }
  0x38   : > { %v1292_v2 = vld [vmem:[%s659_s12 + $0x8] sm:$0xff]  ;;  %v1291_v4 = vld [vmem:[%s659_s12] sm:$0xff]  ;;  %714 = vmatpush.bf16.msra.mxu0 %v1290_v1  ;;  %s1873_s21 = sld [smem:[#allocation23_spill]] (!%p1255_p1) }
  0x39   : > { %747 = vmatpush.bf16.msra.mxu1 %v1292_v2  ;;  %v1697_v5 = vld [vmem:[%s646_s26] sm:$0xff]  ;;  %v1294_v18 = vld [vmem:[%s1683_s1 + $0x8] sm:$0xff]  ;;  %v812_v21 = vshrl.u32 %v811_v20, 7  ;;  %v814_v22 = vand.u32 127, %v811_v20  ;;  %s1874_s17 = sld [smem:[#allocation20_spill]] (!%p1255_p1) }
  0x3a   : > { %v683_v6 = vpack.c.bf16 %v1697_v5, %v1697_v5  ;;  %v1375_v7 = vld [vmem:[%s662_s22] ss:$0 sm:$0xff]  ;;  %780 = vmatpush.bf16.msra.mxu2 %v1294_v18  ;;  %s1875_s16 = sld [smem:[#allocation21_spill]] (!%p1255_p1) }
  0x3b   : > { %v1374_v10 = vld [vmem:[%s654_s28] ss:$0 sm:$0xff]  ;;  %vm815_vm3 = vcmp.ge.s32.totalorder %v812_v21, %v814_v22  ;;  %s1876_s15 = sld [smem:[#allocation22_spill]] (!%p1255_p1) }
  0x3c   : > { %715 = vmatpush.bf16.msra.mxu0 %v1289_v3  ;;  %v1293_v19 = vld [vmem:[%s1683_s1] sm:$0xff]  ;;  %s1877_s27 = sld [smem:[#allocation24_spill]] (!%p1255_p1) }
  0x3d   : > { %748 = vmatpush.bf16.msra.mxu1 %v1291_v4  ;;  %v1376_v28 = vld [vmem:[%s670_s30] ss:$0 sm:$0xff]  ;;  %s1878_s22 = sld [smem:[#allocation25_spill]] (!%p1255_p1) }
  0x3e   : > { %781 = vmatpush.bf16.msra.mxu2 %v1293_v19  ;;  %v851_v39 = vld [vmem:[%s1693_s18] sm:$0xf]  ;;  %s1879_s23 = sld [smem:[#allocation26_spill]] (!%p1255_p1) }
  0x3f   : > { %1233 = vmatmul.msk.bf16.vlgmr.msra.gmra.mxu0 %vm704_vm1, %v683_v6  ;;  %v856_v40 = vsel %vm832_vm4, %v851_v39, 0  ;;  %v850_v48 = vld [vmem:[#allocation2] sm:$0xff] }
  0x40   : > { %1242 = vmatmul.msk.bf16.vlgmr.msra.gmra.mxu1 %vm704_vm1, %v683_v6 }
  0x41   : > { %1251 = vmatmul.msk.bf16.vlgmr.msra.gmra.mxu2 %vm704_vm1, %v683_v6  ;;  %865 = vmatpush.bf16.msrb.mxu1 %v856_v40 }
  0xbc   : > { %v717_v8 = vpop.f32.mrf.mxu0 }
  0xbd   : > { %v750_v9 = vpop.f32.mrf.mxu1  ;;  %v718_v13 = vadd.f32 %v1374_v10, %v717_v8 }
  0xbe   : > { %v751_v11 = vadd.f32 %v1375_v7, %v750_v9 }
  0xbf   : > { %v787_v17 = vpack.c.bf16 %v718_v13, %v718_v13 }
  0xc0   : > { %v788_v12 = vpack.c.bf16 %v751_v11, %v751_v11 }
  0xc2   : > { %v795_v14 = vsel %vm790_vm2, %v788_v12, 0 }
  0xc3   : > { %804 = vmatpush.bf16.xpose.msra.mxu3 %v795_v14 }
  0xc4   : > { %v719_v15 = vpop.f32.mrf.mxu0  ;;  %v783_v29 = vpop.f32.mrf.mxu2 }
  0xc5   : > { %v752_v16 = vpop.f32.mrf.mxu1  ;;  %v784_v30 = vadd.f32 %v1376_v28, %v783_v29 }
  0xc7   : > { %v789_v31 = vpack.c.bf16 %v784_v30, %v784_v30 }
  0xc9   : > { %v834_v34 = vsel %vm832_vm4, %v789_v31, 0 }
  0xca   : > { %1252 = vmatmul.msk.bf16.vlgmr.msra.gmra.mxu3 %vm790_vm2, %v787_v17  ;;  %843 = vmatpush.bf16.msrb.mxu0 %v834_v34 }
  0xcc   : > { %v785_v36 = vpop.f32.mrf.mxu2 }
 0x14d   : > { %v806_v23 = vpop.f32.mrf.mxu3 }
 0x14e   : > { %v810_v24 = vmul.f32 0.35355338, %v806_v23 }
 0x150   : > { %v816_v25 = vsel %vm815_vm3, %v810_v24, -inf }
 0x151   : > { %v817_v26 = vsel %vm790_vm2, %v816_v25, -inf }
 0x152   : > { %818 = vmax.xlane.f32.xlu0 %v817_v26 }
 0x155   : > { %v808_v27 = vpop.f32.mrf.mxu3 }
 0x1c5   : > { %v819_v32 = vpop.xlane.xlu0 %818 }
 0x1c6   : > { %v820_v33 = vsub.f32 %v816_v25, %v819_v32 }
 0x1c8   : > { %v821_v35 = vmul.f32 1.442695, %v820_v33 }
 0x1ca   : > { %1377 = vpow2.f32 %v821_v35 }
 0x1d0   : > { %v1378_v37 = vpop.eup %1377 }
 0x1d1   : > { %v823_v38 = vsel %vm790_vm2, %v1378_v37, 0.0 }
 0x1d2   : > { %824 = vadd.xlane.f32.xlu0 %v823_v38 }
 0x245   : > { %v825_v41 = vpop.xlane.xlu0 %824 }
 0x246   : > { %1379 = vrcp.f32 %v825_v41 }
 0x24c   : > { %v1380_v42 = vpop.eup %1379 }
 0x24d   : > { %v827_v43 = vmul.f32 %v1380_v42, %v1378_v37 }
 0x24f   : > { %v828_v44 = vpack.c.bf16 %v827_v43, %v827_v43 }
 0x251   : > { %1253 = vmatmul.msk.bf16.vlgmr.msrb.gmra.mxu0 %vm790_vm2, %v828_v44 }
 0x2ce   : > { %v845_v45 = vpop.f32.mrf.mxu0 }
 0x2cf   : > { %v849_v46 = vpack.c.bf16 %v845_v45, %v845_v45 }
 0x2d1   : > { %1254 = vmatmul.msk.bf16.vlgmr.msrb.gmra.mxu1 %vm790_vm2, %v849_v46 }
 0x2d6   : > { %v847_v47 = vpop.f32.mrf.mxu0 }
 0x34e   : > { %v867_v49 = vpop.f32.mrf.mxu1 }
 0x34f   : > { %v871_v50 = vadd.f32 %v867_v49, %v850_v48 }
 0x351   : > { %872 = vst.msk [vmem:[#allocation2] sm:$0xff] %vm704_vm1, %v871_v50 }
 0x352   : > { %876 = sbr.rel (%p1255_p1) target bundleno = 1662 (0x67e), region = 96 }
 0x356   : > { %v869_v51 = vpop.f32.mrf.mxu1 }
 0x357   : > { %v1381_v53 = vld [vmem:[%s1822_s8] ss:$0 sm:$0xff]  ;;  %v1491_v57 = vmov 32.0   ;;  %v1300_v7 = vld [vmem:[%s1873_s21 + $0x18] sm:$0xff]  ;;  %v1299_v10 = vld [vmem:[%s1873_s21 + $0x10] sm:$0xff]  ;;  %vm998_vm9 = vcmask 523264  }
 0x358   : > { %v877_v52 = vld [vmem:[#allocation2] sm:$0xff]  ;;  %1388 = vrcp.f32 %v1491_v57  ;;  %1006 = vmatpush.bf16.msra.mxu1 %v1300_v7  ;;  %v1298_v25 = vld [vmem:[%s1873_s21 + $0x8] sm:$0xff] }
 0x359   : > { %v882_v54 = vadd.f32 %v1381_v53, %v877_v52  ;;  %v1295_v6 = vld [vmem:[%s1825_s11] sm:$0xff] }
 0x35a   : > { %v1382_v18 = vld [vmem:[%s1874_s17] ss:$0 sm:$0xff] }
 0x35b   : > { %v883_v55 = vadd.f32 %v882_v54, %v1697_v5  ;;  %v1296_v5 = vld [vmem:[%s1825_s11 + $0x8] sm:$0xff]  ;;  %v1383_v21 = vld [vmem:[%s1875_s16] ss:$0 sm:$0xff] }
 0x35c   : > { %953 = vmatpush.bf16.msra.mxu0 %v1296_v5  ;;  %1007 = vmatpush.bf16.msra.mxu1 %v1299_v10  ;;  %v1297_v26 = vld [vmem:[%s1873_s21] sm:$0xff] }
 0x35d   : > { %v884_v56 = vsel %vm704_vm1, %v883_v55, 0.0  ;;  %v1384_v27 = vld [vmem:[%s1876_s15] ss:$0 sm:$0xff] }
 0x35e   : > { %885 = vadd.xlane.f32.xlu0 %v884_v56  ;;  %v1389_v58 = vpop.eup %1388  ;;  %v1385_v33 = vld [vmem:[%s1877_s27] ss:$0 sm:$0xff] }
 0x35f   : > { %v888_v59 = vmul.f32 32.0, %v1389_v58  ;;  %vm892_vm5 = vweird.f32 %v1389_v58  ;;  %v1386_v53 = vld [vmem:[%s1878_s22] ss:$0 sm:$0xff] }
 0x360   : > { %954 = vmatpush.bf16.msra.mxu0 %v1295_v6  ;;  %1008 = vmatpush.bf16.msra.mxu1 %v1298_v25 }
 0x361   : > { %v889_v60 = vsub.f32 1.0, %v888_v59 }
 0x363   : > { %v890_v61 = vmul.f32 %v1389_v58, %v889_v60 }
 0x364   : > { %1009 = vmatpush.bf16.msra.mxu1 %v1297_v26 }
 0x365   : > { %v891_v62 = vadd.f32 %v1389_v58, %v890_v61 }
 0x367   : > { %v893_v63 = vsel %vm892_vm5, %v1389_v58, %v891_v62 }
 0x3d1   : > { %v886_v0 = vpop.xlane.xlu0 %885 }
 0x3d2   : > { %v894_v1 = vmul.f32 %v893_v63, %v886_v0 }
 0x3d4   : > { %v895_v2 = vsub.f32 %v883_v55, %v894_v1  ;;  %v1387_v55 = vld [vmem:[%s1879_s23] ss:$0 sm:$0xff] }
 0x3d6   : > { %v896_v3 = vmul.f32 %v895_v2, %v895_v2 }
 0x3d8   : > { %v897_v4 = vsel %vm704_vm1, %v896_v3, 0.0 }
 0x3d9   : > { %898 = vadd.xlane.f32.xlu0 %v897_v4 }
 0x44c   : > { %v899_v8 = vpop.xlane.xlu0 %898 }
 0x44d   : > { %v900_v9 = vmul.f32 %v899_v8, %v893_v63 }
 0x44f   : > { %v901_v11 = vadd.f32 1e-05, %v900_v9 }
 0x451   : > { %1390 = vrsqrt.f32 %v901_v11  ;;  %vm908_vm7 = vweird.f32 %v901_v11 }
 0x457   : > { %v1391_v12 = vpop.eup %1390 }
 0x458   : > { %v903_v13 = vmul.f32 %v1391_v12, %v901_v11  ;;  %vm909_vm6 = vweird.f32 %v1391_v12 }
 0x459   : > { %vm910_vm8 = vmor %vm908_vm7, %vm909_vm6 }
 0x45a   : > { %v904_v14 = vmul.f32 %v1391_v12, %v903_v13 }
 0x45c   : > { %v905_v15 = vmul.f32 0.5, %v904_v14 }
 0x45e   : > { %v906_v16 = vsub.f32 1.5, %v905_v15 }
 0x460   : > { %v907_v17 = vmul.f32 %v1391_v12, %v906_v16 }
 0x462   : > { %v911_v19 = vsel %vm910_vm8, %v1391_v12, %v907_v17 }
 0x463   : > { %v912_v20 = vmul.f32 %v911_v19, %v895_v2 }
 0x465   : > { %v917_v22 = vmul.f32 %v1382_v18, %v912_v20 }
 0x467   : > { %v922_v23 = vadd.f32 %v1383_v21, %v917_v22 }
 0x469   : > { %v923_v24 = vpack.c.bf16 %v922_v23, %v922_v23 }
 0x46b   : > { %1264 = vmatmul.msk.bf16.vlgmr.msra.gmra.mxu0 %vm704_vm1, %v923_v24 }
 0x4e8   : > { %v956_v28 = vpop.f32.mrf.mxu0 }
 0x4e9   : > { %v957_v29 = vadd.f32 %v1384_v27, %v956_v28 }
 0x4eb   : > { %v960_v30 = vmax.f32 %v957_v29, 0.0 }
 0x4ed   : > { %v961_v31 = vpack.c.bf16 %v960_v30, %v960_v30 }
 0x4ef   : > { %1281 = vmatmul.msk.bf16.vlgmr.msra.gmra.mxu1 %vm998_vm9, %v961_v31 }
 0x4f0   : > { %v958_v32 = vpop.f32.mrf.mxu0 }
 0x56c   : > { %v1011_v34 = vpop.f32.mrf.mxu1 }
 0x56d   : > { %v1012_v35 = vadd.f32 %v1385_v33, %v1011_v34 }
 0x56f   : > { %v1015_v36 = vadd.f32 %v1012_v35, %v922_v23 }
 0x571   : > { %v1016_v37 = vsel %vm704_vm1, %v1015_v36, 0.0 }
 0x572   : > { %1017 = vadd.xlane.f32.xlu1 %v1016_v37 }
 0x574   : > { %v1013_v38 = vpop.f32.mrf.mxu1 }
 0x5e5   : > { %v1018_v39 = vpop.xlane.xlu1 %1017 }
 0x5e6   : > { %v1019_v40 = vmul.f32 %v1018_v39, %v893_v63 }
 0x5e8   : > { %v1020_v41 = vsub.f32 %v1015_v36, %v1019_v40 }
 0x5ea   : > { %v1021_v42 = vmul.f32 %v1020_v41, %v1020_v41 }
 0x5ec   : > { %v1022_v43 = vsel %vm704_vm1, %v1021_v42, 0.0 }
 0x5ed   : > { %1023 = vadd.xlane.f32.xlu1 %v1022_v43 }
 0x660   : > { %v1024_v44 = vpop.xlane.xlu1 %1023 }
 0x661   : > { %v1025_v45 = vmul.f32 %v1024_v44, %v893_v63 }
 0x663   : > { %v1026_v46 = vadd.f32 1e-05, %v1025_v45 }
 0x665   : > { %1392 = vrsqrt.f32 %v1026_v46  ;;  %vm1033_vm11 = vweird.f32 %v1026_v46 }
 0x66b   : > { %v1393_v47 = vpop.eup %1392 }
 0x66c   : > { %v1028_v48 = vmul.f32 %v1393_v47, %v1026_v46  ;;  %vm1034_vm10 = vweird.f32 %v1393_v47 }
 0x66d   : > { %vm1035_vm12 = vmor %vm1033_vm11, %vm1034_vm10 }
 0x66e   : > { %v1029_v49 = vmul.f32 %v1393_v47, %v1028_v48 }
 0x670   : > { %v1030_v50 = vmul.f32 0.5, %v1029_v49 }
 0x672   : > { %v1031_v51 = vsub.f32 1.5, %v1030_v50 }
 0x674   : > { %v1032_v52 = vmul.f32 %v1393_v47, %v1031_v51 }
 0x676   : > { %v1036_v54 = vsel %vm1035_vm12, %v1393_v47, %v1032_v52 }
 0x677   : > { %v1037_v56 = vmul.f32 %v1036_v54, %v1020_v41 }
 0x679   : > { %v1042_v57 = vmul.f32 %v1386_v53, %v1037_v56 }
 0x67b   : > { %v1047_v58 = vadd.f32 %v1387_v55, %v1042_v57 }
 0x67d   : > { %1048 = vst.msk [vmem:[%s642_s14] sm:$0xff] %vm704_vm1, %v1047_v58 }
 0x67e PF: > { %s1880_s17 = sld [smem:[#allocation9_spill]]  ;;  %s1062_s12 = sshll.u32 %s642_s14, 4  ;;  %s1063_s12 = int_to_ptr.vmem [resolvable:$true] %s1062_s12 }
 0x67f   : > { %s1881_s30 = sld [smem:[#allocation7_spill]] }
 0x680   : > { %s1883_s9 = sld [smem:[#allocation27_spill]] }
 0x684   : > { %s1283_s16 = sshll.u32 %s1880_s17, 3 }
 0x685   : > { %s1884_s15 = sand.u32 1, %s1881_s30  }
 0x686   : > { %s1060_s10 = scalar_lea.hbm %s1883_s9, %s1283_s16  ;;  %s1050_s24 = scalar_lea.sflag [#allocation4], %s1884_s15 }
 0x687   : > { %s1064_s13 = sshll.u32 %s1060_s10, 4  ;;  %s1414_s22 = scalar_lea.hbm %s1883_s9, 16  ;;  %s1065_s13 = int_to_ptr.hbm [resolvable:$true] %s1064_s13 }
 0x688   : > { %s1408_s26 = sshra.s32 %s1065_s13, 4  ;;  %s1409_s26 = int_to_ptr.hbm [resolvable:$true] %s1408_s26 }
 0x689   : > { %s1410_s27 = scalar_lea.hbm %s1409_s26, 8  ;;  %p1415_p6 = scmp.lt.s32.totalorder %s1409_s26, %s1883_s9 }
 0x68a   : > { %p1411_p2 = scmp.ne.s32.totalorder %s1409_s26, %s1410_s27  ;;  %p1416_p7 = scmp.lt.s32.totalorder %s1414_s22, %s1410_s27 }
 0x68c   : > { %p1412_p4 = pnand %p1411_p2, %p1631_p3  ;;  %p1417_p8 = por %p1416_p7, %p1415_p6 }
 0x68e   : > { %p1413_p5 = pneg %p1412_p4 }
 0x690   : > { %p1418_p10 = pnand %p1417_p8, %p1413_p5 }
 0x692   : > { %1421 = shalt.err (!%p1418_p10)
}
 0x693   : > { %1301 = dma.vmem_to_hbm [thread:$0]  (%p1631_p3), %s1063_s12, 128, %s1065_s13, %s1050_s24  }
 0x694 PF: > { %s1885_s29 = sld [smem:[#allocation12_spill]] }
 0x695   : > { %s1886_s14 = sld [smem:[#allocation6_spill]] }
 0x69a   : > { %p1307_p11 = scmp.ge.s32.totalorder %s1885_s29, 2 }
 0x69b   : > { %s1076_s17 = sand.u32 1, %s1886_s14  }
 0x69c   : > { %p1304_p12 = pnand %p1307_p11, %p1641_p9  ;;  %s1077_s30 = scalar_lea.sflag [#allocation4], %s1076_s17 }
 0x69e   : > { %p1305_p13 = pneg %p1304_p12 }
 0x6a0   : > { %1455 = dma.done.wait (%p1305_p13), %s1077_s30, 128  }
 0x6a1   : > { %1457 = vsyncadd (%p1305_p13), %s1077_s30, 4294967168  ;;  %s30_s30 = sadd.s32 1, %s1885_s29   ;;  %s1888_s24 = sld [smem:[#allocation7_spill]] }
 0x6a2   : > { %p27_p0 = scmp.ge.s32.totalorder %s30_s30, 10   ;;  %s1889_s25 = sld [smem:[#allocation8_spill]] }
 0x6a3   : > { %s1890_s26 = sld [smem:[#allocation17_spill]] }
 0x6a4   : > { %s1891_s27 = sld [smem:[#allocation10_spill]]  ;;  %29 = sbr.rel (!%p27_p0) target bundleno = 16 (0x10), region = 152 }
 0x6a5   : > { %s1892_s28 = sld [smem:[#allocation11_spill]] }
 0x6a6   : > { %s1893_s29 = sld [smem:[#allocation13_spill]] }
 0x6a7   : > { %s1894_s0 = sld [smem:[#allocation15_spill]] }
 0x6a9   :  { %1083 = vsyncpa [#allocation4], 1 }
 0x6aa   :  { %1085 = vsyncpa [#allocation4 + $0x1], 1 }

</bundles_post_ra>
